<compile_context>
chip_gen: v7x
topology: tpu7x:2x2x1
jax: 0.10.0
libtpu: 0.0.40
codegen_flags: <defaults>
</compile_context>

<pallas_src>
import jax
import jax.numpy as jnp
import numpy as np
from jax import lax
from jax.experimental import pallas as pl
from jax.experimental.pallas import tpu as pltpu


CFG = [8, "M", 16, "M", 32]      # scaled-down VGG features config
IN_CH = 4                        # input channels
IMG_HW = 16                      # input spatial size (16 x 16)
OUT_DIM = 512                    # 32 channels * 4 * 4 after two 2x2 maxpools

_CIN1_PAD = 8                    # pad input channels 4 -> 8 (sublane aligned)
_S1 = IMG_HW * IMG_HW            # 256 : layer-1 spatial (16x16)
_S2 = 128                        # layer-2 spatial 8x8=64, lane-padded to 128
_S3 = 128                        # layer-3 spatial 4x4=16, lane-padded to 128
_S3_REAL = (IMG_HW // 4) ** 2    # 16


# --------------------------------------------------------------------------
# Fused kernel: one grid step == one image; the whole stack stays in VMEM.
# --------------------------------------------------------------------------
def _vgg_features_kernel(x_ref, w1_ref, b1_ref, w2_ref, b2_ref, w3_ref, b3_ref,
                         p1_ref, p2_ref, o_ref):

    def conv3x3_relu(a, w2d, bias, h, w):
        # a    : (Cin, S)  channel-major activation, S >= h*w (lane padded)
        # w2d  : (Cout, 9*Cin) weight slab, tap-major (kh, kw, cin) rows
        # bias : (Cout, 1)
        s = a.shape[1]
        s_idx = lax.broadcasted_iota(jnp.int32, (1, s), 1)
        w_rem = s_idx & (w - 1)                        # w is a power of two
        slabs = []
        for kh in range(3):
            for kw in range(3):
                dh, dw = kh - 1, kw - 1
                delta = dh * w + dw
                # rolled[:, s] == a[:, (s + delta) % S]; wrapped columns are
                # exactly the out-of-image taps, which the mask zeroes below.
                rolled = a if delta == 0 else pltpu.roll(a, (-delta) % s, 1)
                cond = None
                if dh == -1:
                    cond = s_idx >= w                  # row >= 1
                elif dh == 1:
                    cond = s_idx < (h - 1) * w         # row <= h-2
                if dw == -1:
                    c2 = w_rem >= 1                    # col >= 1
                    cond = c2 if cond is None else cond & c2
                elif dw == 1:
                    c2 = w_rem < (w - 1)               # col <= w-2
                    cond = c2 if cond is None else cond & c2
                if cond is not None:
                    rolled = rolled * cond.astype(jnp.float32)
                slabs.append(rolled)
        patches = jnp.concatenate(slabs, axis=0)       # (9*Cin, S)
        y = jnp.dot(w2d, patches, preferred_element_type=jnp.float32)
        return jnp.maximum(y + bias, 0.0)              # (Cout, S)

    def maxpool2x2(a, sel, w):
        # a: (C, S); sel: (S, S_out) one-hot stride-2 decimation matrix.
        s = a.shape[1]
        m = jnp.maximum(a, pltpu.roll(a, s - 1, 1))    # pair-max along columns
        m = jnp.maximum(m, pltpu.roll(m, s - w, 1))    # pair-max along rows
        return jnp.dot(m, sel, preferred_element_type=jnp.float32)

    a = x_ref[0]                                                    # (8, 256)
    a = conv3x3_relu(a, w1_ref[...], b1_ref[...], IMG_HW, IMG_HW)   # (8, 256)
    a = maxpool2x2(a, p1_ref[...], IMG_HW)                          # (8, 128)
    a = conv3x3_relu(a, w2_ref[...], b2_ref[...],
                     IMG_HW // 2, IMG_HW // 2)                      # (16, 128)
    a = maxpool2x2(a, p2_ref[...], IMG_HW // 2)                     # (16, 128)
    a = conv3x3_relu(a, w3_ref[...], b3_ref[...],
                     IMG_HW // 4, IMG_HW // 4)                      # (32, 128)
    o_ref[0] = a.astype(o_ref.dtype)   # NCHW-flat rows; columns >= 16 are pad


# --------------------------------------------------------------------------
# Host-side parameter plumbing
# --------------------------------------------------------------------------
def _conv_weight_slab(w_hwio, cin_pad):
    """HWIO (3,3,Cin,Cout) -> (Cout, 9*cin_pad) matching the kernel's tap-major
    (kh, kw, cin) patch-row layout (padded cin columns are zero)."""
    _, _, cin, cout = w_hwio.shape
    if cin_pad > cin:
        w_hwio = jnp.pad(w_hwio, ((0, 0), (0, 0), (0, cin_pad - cin), (0, 0)))
    return jnp.transpose(w_hwio, (3, 0, 1, 2)).reshape(cout, 9 * cin_pad)


def _pool_select_matrix(h, w, s_in, s_out):
    """One-hot (s_in, s_out): column h2*(w//2)+w2 selects input position
    (2*h2)*w + 2*w2, i.e. stride-2 decimation of a 2x2-max'ed (h, w) grid."""
    ho, wo = h // 2, w // 2
    sel = np.zeros((s_in, s_out), np.float32)
    for h2 in range(ho):
        for w2 in range(wo):
            sel[(2 * h2) * w + 2 * w2, h2 * wo + w2] = 1.0
    return sel


@jax.jit
def vgg_forward(x_nchw, params):
    n, c, h, w = x_nchw.shape
    assert (c, h, w) == (IN_CH, IMG_HW, IMG_HW)
    (w1, b1), (w2, b2), (w3, b3) = params

    # Channel-major, spatially-flattened input; pad channels 4 -> 8 so all
    # im2col slabs are sublane(8)-aligned.
    x = x_nchw.reshape(n, c, h * w)
    x = jnp.pad(x, ((0, 0), (0, _CIN1_PAD - c), (0, 0)))

    w1s = _conv_weight_slab(w1, _CIN1_PAD)            # (8,  72)
    w2s = _conv_weight_slab(w2, w2.shape[2])          # (16, 72)
    w3s = _conv_weight_slab(w3, w3.shape[2])          # (32, 144)
    b1c, b2c, b3c = b1.reshape(-1, 1), b2.reshape(-1, 1), b3.reshape(-1, 1)
    p1 = jnp.asarray(_pool_select_matrix(IMG_HW, IMG_HW, _S1, _S2))
    p2 = jnp.asarray(_pool_select_matrix(IMG_HW // 2, IMG_HW // 2, _S2, _S3))

    c_out = CFG[-1]

    def resident(arr):
        return pl.BlockSpec(arr.shape, lambda i: (0,) * arr.ndim)

    out = pl.pallas_call(
        _vgg_features_kernel,
        out_shape=jax.ShapeDtypeStruct((n, c_out, _S3), x_nchw.dtype),
        grid_spec=pltpu.PrefetchScalarGridSpec(
            num_scalar_prefetch=0,
            grid=(n,),
            in_specs=[
                pl.BlockSpec((1, _CIN1_PAD, _S1), lambda i: (i, 0, 0)),
                resident(w1s), resident(b1c),
                resident(w2s), resident(b2c),
                resident(w3s), resident(b3c),
                resident(p1), resident(p2),
            ],
            out_specs=pl.BlockSpec((1, c_out, _S3), lambda i: (i, 0, 0)),
        ),
        compiler_params=pltpu.CompilerParams(
            dimension_semantics=("parallel",)),
    )(x, w1s, b1c, w2s, b2c, w3s, b3c, p1, p2)

    # Drop the lane padding of the last layer and flatten in NCHW order,
    # exactly matching PyTorch's `output.view(N, -1)`.
    return out[:, :, :_S3_REAL].reshape(n, c_out * _S3_REAL)


# --------------------------------------------------------------------------
# Pure-JAX reference + params
# --------------------------------------------------------------------------
def init_params(key, in_ch, cfg=CFG):
    params = []
    c = in_ch
    for v in cfg:
        if v == "M":
            continue
        key, kw_, kb_ = jax.random.split(key, 3)
        wgt = jax.random.normal(kw_, (3, 3, c, v), jnp.float32) * 0.1   # HWIO
        bia = jax.random.normal(kb_, (v,), jnp.float32) * 0.01
        params.append((wgt, bia))
        c = v
    return params


def vgg_reference(x_nchw, params):
    x = jnp.transpose(x_nchw, (0, 2, 3, 1))            # NCHW -> NHWC
    pi = 0
    for v in CFG:
        if v == "M":
            x = lax.reduce_window(x, -jnp.inf, lax.max,
                                  (1, 2, 2, 1), (1, 2, 2, 1), "VALID")
        else:
            wgt, bia = params[pi]
            pi += 1
            y = lax.conv_general_dilated(
                x, wgt, (1, 1), "SAME",
                dimension_numbers=("NHWC", "HWIO", "NHWC"),
                precision=lax.Precision.HIGHEST)
            x = jnp.maximum(y + bia, 0.0)
    x = jnp.transpose(x, (0, 3, 1, 2))                 # back to NCHW
    return x.reshape(x.shape[0], -1)


# --------------------------------------------------------------------------
if __name__ == "__main__":
    key = jax.random.PRNGKey(0)
    kx, kp = jax.random.split(key)

    N = 2
    x = jax.random.normal(kx, (N, IN_CH, IMG_HW, IMG_HW), jnp.float32)
    params = init_params(kp, IN_CH, CFG)

    out = jax.block_until_ready(vgg_forward(x, params))
    assert out.shape == (N, OUT_DIM), out.shape

    ref = jax.block_until_ready(vgg_reference(x, params))
    # Both paths accumulate in f32 (kernel: multi-pass f32 MXU; reference:
    # HIGHEST-precision conv), so a tight tolerance is appropriate.
    np.testing.assert_allclose(np.asarray(out), np.asarray(ref),
                               atol=1e-3, rtol=1e-3)
    print("KERNEL_OK")
</pallas_src>

<mosaic_0001>
module attributes {stable_mosaic.version = 11 : i64} {
  func.func @_vgg_features_kernel(%arg0: i32, %arg1: memref<1x8x256xf32, #tpu.memory_space<vmem>>, %arg2: memref<8x72xf32, #tpu.memory_space<vmem>>, %arg3: memref<8x1xf32, #tpu.memory_space<vmem>>, %arg4: memref<16x72xf32, #tpu.memory_space<vmem>>, %arg5: memref<16x1xf32, #tpu.memory_space<vmem>>, %arg6: memref<32x144xf32, #tpu.memory_space<vmem>>, %arg7: memref<32x1xf32, #tpu.memory_space<vmem>>, %arg8: memref<256x128xf32, #tpu.memory_space<vmem>>, %arg9: memref<128x128xf32, #tpu.memory_space<vmem>>, %arg10: memref<1x32x128xf32, #tpu.memory_space<vmem>>) attributes {dimension_semantics = [#tpu.dimension_semantics<parallel>], iteration_bounds = array<i64: 2>, scalar_prefetch = 0 : i64, scratch_operands = 0 : i64, tpu.core_type = #tpu.core_type<tc>, window_params = [{transform_indices = @transform_0, window_bounds = array<i64: 1, 8, 256>}, {pipeline_mode = #tpu.pipeline_mode<synchronous>, transform_indices = @transform_1, window_bounds = array<i64: 8, 72>}, {pipeline_mode = #tpu.pipeline_mode<synchronous>, transform_indices = @transform_2, window_bounds = array<i64: 8, 1>}, {pipeline_mode = #tpu.pipeline_mode<synchronous>, transform_indices = @transform_3, window_bounds = array<i64: 16, 72>}, {pipeline_mode = #tpu.pipeline_mode<synchronous>, transform_indices = @transform_4, window_bounds = array<i64: 16, 1>}, {pipeline_mode = #tpu.pipeline_mode<synchronous>, transform_indices = @transform_5, window_bounds = array<i64: 32, 144>}, {pipeline_mode = #tpu.pipeline_mode<synchronous>, transform_indices = @transform_6, window_bounds = array<i64: 32, 1>}, {pipeline_mode = #tpu.pipeline_mode<synchronous>, transform_indices = @transform_7, window_bounds = array<i64: 256, 128>}, {pipeline_mode = #tpu.pipeline_mode<synchronous>, transform_indices = @transform_8, window_bounds = array<i64: 128, 128>}, {transform_indices = @transform_9, window_bounds = array<i64: 1, 32, 128>}]} {
    %c0 = arith.constant 0 : index
    %c0_0 = arith.constant 0 : index
    %c0_1 = arith.constant 0 : index
    %0 = vector.load %arg1[%c0, %c0_0, %c0_1] : memref<1x8x256xf32, #tpu.memory_space<vmem>>, vector<1x8x256xf32>
    %1 = vector.shape_cast %0 : vector<1x8x256xf32> to vector<8x256xf32>
    %c0_2 = arith.constant 0 : index
    %c0_3 = arith.constant 0 : index
    %2 = vector.load %arg2[%c0_2, %c0_3] : memref<8x72xf32, #tpu.memory_space<vmem>>, vector<8x72xf32>
    %c0_4 = arith.constant 0 : index
    %c0_5 = arith.constant 0 : index
    %3 = vector.load %arg3[%c0_4, %c0_5] : memref<8x1xf32, #tpu.memory_space<vmem>>, vector<8x1xf32>
    %4 = tpu.iota {dimensions = array<i32: 1>} : vector<1x256xi32>
    %c15_i32 = arith.constant 15 : i32
    %5 = vector.broadcast %c15_i32 : i32 to vector<1x256xi32>
    %6 = arith.andi %4, %5 : vector<1x256xi32>
    %c17_i32 = arith.constant 17 : i32
    %7 = tpu.dynamic_rotate %1 by %c17_i32 dim 1 : vector<8x256xf32>, i32 -> vector<8x256xf32>
    %c16_i32 = arith.constant 16 : i32
    %8 = vector.broadcast %c16_i32 : i32 to vector<1x256xi32>
    %9 = arith.cmpi sge, %4, %8 : vector<1x256xi32>
    %c1_i32 = arith.constant 1 : i32
    %10 = vector.broadcast %c1_i32 : i32 to vector<1x256xi32>
    %11 = arith.cmpi sge, %6, %10 : vector<1x256xi32>
    %12 = arith.andi %9, %11 : vector<1x256xi1>
    %13 = arith.extui %12 : vector<1x256xi1> to vector<1x256xi32>
    %14 = arith.sitofp %13 : vector<1x256xi32> to vector<1x256xf32>
    %15 = vector.broadcast %14 : vector<1x256xf32> to vector<8x256xf32>
    %16 = arith.mulf %7, %15 : vector<8x256xf32>
    %c16_i32_6 = arith.constant 16 : i32
    %17 = tpu.dynamic_rotate %1 by %c16_i32_6 dim 1 : vector<8x256xf32>, i32 -> vector<8x256xf32>
    %c16_i32_7 = arith.constant 16 : i32
    %18 = vector.broadcast %c16_i32_7 : i32 to vector<1x256xi32>
    %19 = arith.cmpi sge, %4, %18 : vector<1x256xi32>
    %20 = arith.extui %19 : vector<1x256xi1> to vector<1x256xi32>
    %21 = arith.sitofp %20 : vector<1x256xi32> to vector<1x256xf32>
    %22 = vector.broadcast %21 : vector<1x256xf32> to vector<8x256xf32>
    %23 = arith.mulf %17, %22 : vector<8x256xf32>
    %c15_i32_8 = arith.constant 15 : i32
    %24 = tpu.dynamic_rotate %1 by %c15_i32_8 dim 1 : vector<8x256xf32>, i32 -> vector<8x256xf32>
    %c16_i32_9 = arith.constant 16 : i32
    %25 = vector.broadcast %c16_i32_9 : i32 to vector<1x256xi32>
    %26 = arith.cmpi sge, %4, %25 : vector<1x256xi32>
    %c15_i32_10 = arith.constant 15 : i32
    %27 = vector.broadcast %c15_i32_10 : i32 to vector<1x256xi32>
    %28 = arith.cmpi slt, %6, %27 : vector<1x256xi32>
    %29 = arith.andi %26, %28 : vector<1x256xi1>
    %30 = arith.extui %29 : vector<1x256xi1> to vector<1x256xi32>
    %31 = arith.sitofp %30 : vector<1x256xi32> to vector<1x256xf32>
    %32 = vector.broadcast %31 : vector<1x256xf32> to vector<8x256xf32>
    %33 = arith.mulf %24, %32 : vector<8x256xf32>
    %c1_i32_11 = arith.constant 1 : i32
    %34 = tpu.dynamic_rotate %1 by %c1_i32_11 dim 1 : vector<8x256xf32>, i32 -> vector<8x256xf32>
    %c1_i32_12 = arith.constant 1 : i32
    %35 = vector.broadcast %c1_i32_12 : i32 to vector<1x256xi32>
    %36 = arith.cmpi sge, %6, %35 : vector<1x256xi32>
    %37 = arith.extui %36 : vector<1x256xi1> to vector<1x256xi32>
    %38 = arith.sitofp %37 : vector<1x256xi32> to vector<1x256xf32>
    %39 = vector.broadcast %38 : vector<1x256xf32> to vector<8x256xf32>
    %40 = arith.mulf %34, %39 : vector<8x256xf32>
    %c255_i32 = arith.constant 255 : i32
    %41 = tpu.dynamic_rotate %1 by %c255_i32 dim 1 : vector<8x256xf32>, i32 -> vector<8x256xf32>
    %c15_i32_13 = arith.constant 15 : i32
    %42 = vector.broadcast %c15_i32_13 : i32 to vector<1x256xi32>
    %43 = arith.cmpi slt, %6, %42 : vector<1x256xi32>
    %44 = arith.extui %43 : vector<1x256xi1> to vector<1x256xi32>
    %45 = arith.sitofp %44 : vector<1x256xi32> to vector<1x256xf32>
    %46 = vector.broadcast %45 : vector<1x256xf32> to vector<8x256xf32>
    %47 = arith.mulf %41, %46 : vector<8x256xf32>
    %c241_i32 = arith.constant 241 : i32
    %48 = tpu.dynamic_rotate %1 by %c241_i32 dim 1 : vector<8x256xf32>, i32 -> vector<8x256xf32>
    %c240_i32 = arith.constant 240 : i32
    %49 = vector.broadcast %c240_i32 : i32 to vector<1x256xi32>
    %50 = arith.cmpi slt, %4, %49 : vector<1x256xi32>
    %c1_i32_14 = arith.constant 1 : i32
    %51 = vector.broadcast %c1_i32_14 : i32 to vector<1x256xi32>
    %52 = arith.cmpi sge, %6, %51 : vector<1x256xi32>
    %53 = arith.andi %50, %52 : vector<1x256xi1>
    %54 = arith.extui %53 : vector<1x256xi1> to vector<1x256xi32>
    %55 = arith.sitofp %54 : vector<1x256xi32> to vector<1x256xf32>
    %56 = vector.broadcast %55 : vector<1x256xf32> to vector<8x256xf32>
    %57 = arith.mulf %48, %56 : vector<8x256xf32>
    %c240_i32_15 = arith.constant 240 : i32
    %58 = tpu.dynamic_rotate %1 by %c240_i32_15 dim 1 : vector<8x256xf32>, i32 -> vector<8x256xf32>
    %c240_i32_16 = arith.constant 240 : i32
    %59 = vector.broadcast %c240_i32_16 : i32 to vector<1x256xi32>
    %60 = arith.cmpi slt, %4, %59 : vector<1x256xi32>
    %61 = arith.extui %60 : vector<1x256xi1> to vector<1x256xi32>
    %62 = arith.sitofp %61 : vector<1x256xi32> to vector<1x256xf32>
    %63 = vector.broadcast %62 : vector<1x256xf32> to vector<8x256xf32>
    %64 = arith.mulf %58, %63 : vector<8x256xf32>
    %c239_i32 = arith.constant 239 : i32
    %65 = tpu.dynamic_rotate %1 by %c239_i32 dim 1 : vector<8x256xf32>, i32 -> vector<8x256xf32>
    %c240_i32_17 = arith.constant 240 : i32
    %66 = vector.broadcast %c240_i32_17 : i32 to vector<1x256xi32>
    %67 = arith.cmpi slt, %4, %66 : vector<1x256xi32>
    %c15_i32_18 = arith.constant 15 : i32
    %68 = vector.broadcast %c15_i32_18 : i32 to vector<1x256xi32>
    %69 = arith.cmpi slt, %6, %68 : vector<1x256xi32>
    %70 = arith.andi %67, %69 : vector<1x256xi1>
    %71 = arith.extui %70 : vector<1x256xi1> to vector<1x256xi32>
    %72 = arith.sitofp %71 : vector<1x256xi32> to vector<1x256xf32>
    %73 = vector.broadcast %72 : vector<1x256xf32> to vector<8x256xf32>
    %74 = arith.mulf %65, %73 : vector<8x256xf32>
    %75 = tpu.concatenate %16, %23, %33, %40, %1, %47, %57, %64, %74 in 0 : vector<8x256xf32>, vector<8x256xf32>, vector<8x256xf32>, vector<8x256xf32>, vector<8x256xf32>, vector<8x256xf32>, vector<8x256xf32>, vector<8x256xf32>, vector<8x256xf32> -> vector<72x256xf32>
    %cst = arith.constant dense<0.000000e+00> : vector<8x256xf32>
    %76 = tpu.matmul %2, %75, %cst {dimension_numbers = #tpu.dot_dimension_numbers<[1], [0], [0], [1], [0, 0, 1, 1], [], []>} : vector<8x72xf32>, vector<72x256xf32>, vector<8x256xf32> -> vector<8x256xf32>
    %77 = vector.broadcast %3 : vector<8x1xf32> to vector<8x256xf32>
    %78 = arith.addf %76, %77 : vector<8x256xf32>
    %cst_19 = arith.constant 0.000000e+00 : f32
    %79 = vector.broadcast %cst_19 : f32 to vector<8x256xf32>
    %80 = arith.maximumf %78, %79 : vector<8x256xf32>
    %c0_20 = arith.constant 0 : index
    %c0_21 = arith.constant 0 : index
    %81 = vector.load %arg8[%c0_20, %c0_21] : memref<256x128xf32, #tpu.memory_space<vmem>>, vector<256x128xf32>
    %c255_i32_22 = arith.constant 255 : i32
    %82 = tpu.dynamic_rotate %80 by %c255_i32_22 dim 1 : vector<8x256xf32>, i32 -> vector<8x256xf32>
    %83 = arith.maximumf %80, %82 : vector<8x256xf32>
    %c240_i32_23 = arith.constant 240 : i32
    %84 = tpu.dynamic_rotate %83 by %c240_i32_23 dim 1 : vector<8x256xf32>, i32 -> vector<8x256xf32>
    %85 = arith.maximumf %83, %84 : vector<8x256xf32>
    %cst_24 = arith.constant dense<0.000000e+00> : vector<8x128xf32>
    %86 = tpu.matmul %85, %81, %cst_24 {dimension_numbers = #tpu.dot_dimension_numbers<[1], [0], [0], [1], [0, 0, 1, 1], [], []>} : vector<8x256xf32>, vector<256x128xf32>, vector<8x128xf32> -> vector<8x128xf32>
    %c0_25 = arith.constant 0 : index
    %c0_26 = arith.constant 0 : index
    %87 = vector.load %arg4[%c0_25, %c0_26] : memref<16x72xf32, #tpu.memory_space<vmem>>, vector<16x72xf32>
    %c0_27 = arith.constant 0 : index
    %c0_28 = arith.constant 0 : index
    %88 = vector.load %arg5[%c0_27, %c0_28] : memref<16x1xf32, #tpu.memory_space<vmem>>, vector<16x1xf32>
    %89 = tpu.iota {dimensions = array<i32: 1>} : vector<1x128xi32>
    %c7_i32 = arith.constant 7 : i32
    %90 = vector.broadcast %c7_i32 : i32 to vector<1x128xi32>
    %91 = arith.andi %89, %90 : vector<1x128xi32>
    %c9_i32 = arith.constant 9 : i32
    %92 = tpu.dynamic_rotate %86 by %c9_i32 dim 1 : vector<8x128xf32>, i32 -> vector<8x128xf32>
    %c8_i32 = arith.constant 8 : i32
    %93 = vector.broadcast %c8_i32 : i32 to vector<1x128xi32>
    %94 = arith.cmpi sge, %89, %93 : vector<1x128xi32>
    %c1_i32_29 = arith.constant 1 : i32
    %95 = vector.broadcast %c1_i32_29 : i32 to vector<1x128xi32>
    %96 = arith.cmpi sge, %91, %95 : vector<1x128xi32>
    %97 = arith.andi %94, %96 : vector<1x128xi1>
    %98 = arith.extui %97 : vector<1x128xi1> to vector<1x128xi32>
    %99 = arith.sitofp %98 : vector<1x128xi32> to vector<1x128xf32>
    %100 = vector.broadcast %99 : vector<1x128xf32> to vector<8x128xf32>
    %101 = arith.mulf %92, %100 : vector<8x128xf32>
    %c8_i32_30 = arith.constant 8 : i32
    %102 = tpu.dynamic_rotate %86 by %c8_i32_30 dim 1 : vector<8x128xf32>, i32 -> vector<8x128xf32>
    %c8_i32_31 = arith.constant 8 : i32
    %103 = vector.broadcast %c8_i32_31 : i32 to vector<1x128xi32>
    %104 = arith.cmpi sge, %89, %103 : vector<1x128xi32>
    %105 = arith.extui %104 : vector<1x128xi1> to vector<1x128xi32>
    %106 = arith.sitofp %105 : vector<1x128xi32> to vector<1x128xf32>
    %107 = vector.broadcast %106 : vector<1x128xf32> to vector<8x128xf32>
    %108 = arith.mulf %102, %107 : vector<8x128xf32>
    %c7_i32_32 = arith.constant 7 : i32
    %109 = tpu.dynamic_rotate %86 by %c7_i32_32 dim 1 : vector<8x128xf32>, i32 -> vector<8x128xf32>
    %c8_i32_33 = arith.constant 8 : i32
    %110 = vector.broadcast %c8_i32_33 : i32 to vector<1x128xi32>
    %111 = arith.cmpi sge, %89, %110 : vector<1x128xi32>
    %c7_i32_34 = arith.constant 7 : i32
    %112 = vector.broadcast %c7_i32_34 : i32 to vector<1x128xi32>
    %113 = arith.cmpi slt, %91, %112 : vector<1x128xi32>
    %114 = arith.andi %111, %113 : vector<1x128xi1>
    %115 = arith.extui %114 : vector<1x128xi1> to vector<1x128xi32>
    %116 = arith.sitofp %115 : vector<1x128xi32> to vector<1x128xf32>
    %117 = vector.broadcast %116 : vector<1x128xf32> to vector<8x128xf32>
    %118 = arith.mulf %109, %117 : vector<8x128xf32>
    %c1_i32_35 = arith.constant 1 : i32
    %119 = tpu.dynamic_rotate %86 by %c1_i32_35 dim 1 : vector<8x128xf32>, i32 -> vector<8x128xf32>
    %c1_i32_36 = arith.constant 1 : i32
    %120 = vector.broadcast %c1_i32_36 : i32 to vector<1x128xi32>
    %121 = arith.cmpi sge, %91, %120 : vector<1x128xi32>
    %122 = arith.extui %121 : vector<1x128xi1> to vector<1x128xi32>
    %123 = arith.sitofp %122 : vector<1x128xi32> to vector<1x128xf32>
    %124 = vector.broadcast %123 : vector<1x128xf32> to vector<8x128xf32>
    %125 = arith.mulf %119, %124 : vector<8x128xf32>
    %c127_i32 = arith.constant 127 : i32
    %126 = tpu.dynamic_rotate %86 by %c127_i32 dim 1 : vector<8x128xf32>, i32 -> vector<8x128xf32>
    %c7_i32_37 = arith.constant 7 : i32
    %127 = vector.broadcast %c7_i32_37 : i32 to vector<1x128xi32>
    %128 = arith.cmpi slt, %91, %127 : vector<1x128xi32>
    %129 = arith.extui %128 : vector<1x128xi1> to vector<1x128xi32>
    %130 = arith.sitofp %129 : vector<1x128xi32> to vector<1x128xf32>
    %131 = vector.broadcast %130 : vector<1x128xf32> to vector<8x128xf32>
    %132 = arith.mulf %126, %131 : vector<8x128xf32>
    %c121_i32 = arith.constant 121 : i32
    %133 = tpu.dynamic_rotate %86 by %c121_i32 dim 1 : vector<8x128xf32>, i32 -> vector<8x128xf32>
    %c56_i32 = arith.constant 56 : i32
    %134 = vector.broadcast %c56_i32 : i32 to vector<1x128xi32>
    %135 = arith.cmpi slt, %89, %134 : vector<1x128xi32>
    %c1_i32_38 = arith.constant 1 : i32
    %136 = vector.broadcast %c1_i32_38 : i32 to vector<1x128xi32>
    %137 = arith.cmpi sge, %91, %136 : vector<1x128xi32>
    %138 = arith.andi %135, %137 : vector<1x128xi1>
    %139 = arith.extui %138 : vector<1x128xi1> to vector<1x128xi32>
    %140 = arith.sitofp %139 : vector<1x128xi32> to vector<1x128xf32>
    %141 = vector.broadcast %140 : vector<1x128xf32> to vector<8x128xf32>
    %142 = arith.mulf %133, %141 : vector<8x128xf32>
    %c120_i32 = arith.constant 120 : i32
    %143 = tpu.dynamic_rotate %86 by %c120_i32 dim 1 : vector<8x128xf32>, i32 -> vector<8x128xf32>
    %c56_i32_39 = arith.constant 56 : i32
    %144 = vector.broadcast %c56_i32_39 : i32 to vector<1x128xi32>
    %145 = arith.cmpi slt, %89, %144 : vector<1x128xi32>
    %146 = arith.extui %145 : vector<1x128xi1> to vector<1x128xi32>
    %147 = arith.sitofp %146 : vector<1x128xi32> to vector<1x128xf32>
    %148 = vector.broadcast %147 : vector<1x128xf32> to vector<8x128xf32>
    %149 = arith.mulf %143, %148 : vector<8x128xf32>
    %c119_i32 = arith.constant 119 : i32
    %150 = tpu.dynamic_rotate %86 by %c119_i32 dim 1 : vector<8x128xf32>, i32 -> vector<8x128xf32>
    %c56_i32_40 = arith.constant 56 : i32
    %151 = vector.broadcast %c56_i32_40 : i32 to vector<1x128xi32>
    %152 = arith.cmpi slt, %89, %151 : vector<1x128xi32>
    %c7_i32_41 = arith.constant 7 : i32
    %153 = vector.broadcast %c7_i32_41 : i32 to vector<1x128xi32>
    %154 = arith.cmpi slt, %91, %153 : vector<1x128xi32>
    %155 = arith.andi %152, %154 : vector<1x128xi1>
    %156 = arith.extui %155 : vector<1x128xi1> to vector<1x128xi32>
    %157 = arith.sitofp %156 : vector<1x128xi32> to vector<1x128xf32>
    %158 = vector.broadcast %157 : vector<1x128xf32> to vector<8x128xf32>
    %159 = arith.mulf %150, %158 : vector<8x128xf32>
    %160 = tpu.concatenate %101, %108, %118, %125, %86, %132, %142, %149, %159 in 0 : vector<8x128xf32>, vector<8x128xf32>, vector<8x128xf32>, vector<8x128xf32>, vector<8x128xf32>, vector<8x128xf32>, vector<8x128xf32>, vector<8x128xf32>, vector<8x128xf32> -> vector<72x128xf32>
    %cst_42 = arith.constant dense<0.000000e+00> : vector<16x128xf32>
    %161 = tpu.matmul %87, %160, %cst_42 {dimension_numbers = #tpu.dot_dimension_numbers<[1], [0], [0], [1], [0, 0, 1, 1], [], []>} : vector<16x72xf32>, vector<72x128xf32>, vector<16x128xf32> -> vector<16x128xf32>
    %162 = vector.broadcast %88 : vector<16x1xf32> to vector<16x128xf32>
    %163 = arith.addf %161, %162 : vector<16x128xf32>
    %cst_43 = arith.constant 0.000000e+00 : f32
    %164 = vector.broadcast %cst_43 : f32 to vector<16x128xf32>
    %165 = arith.maximumf %163, %164 : vector<16x128xf32>
    %c0_44 = arith.constant 0 : index
    %c0_45 = arith.constant 0 : index
    %166 = vector.load %arg9[%c0_44, %c0_45] : memref<128x128xf32, #tpu.memory_space<vmem>>, vector<128x128xf32>
    %c127_i32_46 = arith.constant 127 : i32
    %167 = tpu.dynamic_rotate %165 by %c127_i32_46 dim 1 : vector<16x128xf32>, i32 -> vector<16x128xf32>
    %168 = arith.maximumf %165, %167 : vector<16x128xf32>
    %c120_i32_47 = arith.constant 120 : i32
    %169 = tpu.dynamic_rotate %168 by %c120_i32_47 dim 1 : vector<16x128xf32>, i32 -> vector<16x128xf32>
    %170 = arith.maximumf %168, %169 : vector<16x128xf32>
    %cst_48 = arith.constant dense<0.000000e+00> : vector<16x128xf32>
    %171 = tpu.matmul %170, %166, %cst_48 {dimension_numbers = #tpu.dot_dimension_numbers<[1], [0], [0], [1], [0, 0, 1, 1], [], []>} : vector<16x128xf32>, vector<128x128xf32>, vector<16x128xf32> -> vector<16x128xf32>
    %c0_49 = arith.constant 0 : index
    %c0_50 = arith.constant 0 : index
    %172 = vector.load %arg6[%c0_49, %c0_50] : memref<32x144xf32, #tpu.memory_space<vmem>>, vector<32x144xf32>
    %c0_51 = arith.constant 0 : index
    %c0_52 = arith.constant 0 : index
    %173 = vector.load %arg7[%c0_51, %c0_52] : memref<32x1xf32, #tpu.memory_space<vmem>>, vector<32x1xf32>
    %174 = tpu.iota {dimensions = array<i32: 1>} : vector<1x128xi32>
    %c3_i32 = arith.constant 3 : i32
    %175 = vector.broadcast %c3_i32 : i32 to vector<1x128xi32>
    %176 = arith.andi %174, %175 : vector<1x128xi32>
    %c5_i32 = arith.constant 5 : i32
    %177 = tpu.dynamic_rotate %171 by %c5_i32 dim 1 : vector<16x128xf32>, i32 -> vector<16x128xf32>
    %c4_i32 = arith.constant 4 : i32
    %178 = vector.broadcast %c4_i32 : i32 to vector<1x128xi32>
    %179 = arith.cmpi sge, %174, %178 : vector<1x128xi32>
    %c1_i32_53 = arith.constant 1 : i32
    %180 = vector.broadcast %c1_i32_53 : i32 to vector<1x128xi32>
    %181 = arith.cmpi sge, %176, %180 : vector<1x128xi32>
    %182 = arith.andi %179, %181 : vector<1x128xi1>
    %183 = arith.extui %182 : vector<1x128xi1> to vector<1x128xi32>
    %184 = arith.sitofp %183 : vector<1x128xi32> to vector<1x128xf32>
    %185 = vector.broadcast %184 : vector<1x128xf32> to vector<16x128xf32>
    %186 = arith.mulf %177, %185 : vector<16x128xf32>
    %c4_i32_54 = arith.constant 4 : i32
    %187 = tpu.dynamic_rotate %171 by %c4_i32_54 dim 1 : vector<16x128xf32>, i32 -> vector<16x128xf32>
    %c4_i32_55 = arith.constant 4 : i32
    %188 = vector.broadcast %c4_i32_55 : i32 to vector<1x128xi32>
    %189 = arith.cmpi sge, %174, %188 : vector<1x128xi32>
    %190 = arith.extui %189 : vector<1x128xi1> to vector<1x128xi32>
    %191 = arith.sitofp %190 : vector<1x128xi32> to vector<1x128xf32>
    %192 = vector.broadcast %191 : vector<1x128xf32> to vector<16x128xf32>
    %193 = arith.mulf %187, %192 : vector<16x128xf32>
    %c3_i32_56 = arith.constant 3 : i32
    %194 = tpu.dynamic_rotate %171 by %c3_i32_56 dim 1 : vector<16x128xf32>, i32 -> vector<16x128xf32>
    %c4_i32_57 = arith.constant 4 : i32
    %195 = vector.broadcast %c4_i32_57 : i32 to vector<1x128xi32>
    %196 = arith.cmpi sge, %174, %195 : vector<1x128xi32>
    %c3_i32_58 = arith.constant 3 : i32
    %197 = vector.broadcast %c3_i32_58 : i32 to vector<1x128xi32>
    %198 = arith.cmpi slt, %176, %197 : vector<1x128xi32>
    %199 = arith.andi %196, %198 : vector<1x128xi1>
    %200 = arith.extui %199 : vector<1x128xi1> to vector<1x128xi32>
    %201 = arith.sitofp %200 : vector<1x128xi32> to vector<1x128xf32>
    %202 = vector.broadcast %201 : vector<1x128xf32> to vector<16x128xf32>
    %203 = arith.mulf %194, %202 : vector<16x128xf32>
    %c1_i32_59 = arith.constant 1 : i32
    %204 = tpu.dynamic_rotate %171 by %c1_i32_59 dim 1 : vector<16x128xf32>, i32 -> vector<16x128xf32>
    %c1_i32_60 = arith.constant 1 : i32
    %205 = vector.broadcast %c1_i32_60 : i32 to vector<1x128xi32>
    %206 = arith.cmpi sge, %176, %205 : vector<1x128xi32>
    %207 = arith.extui %206 : vector<1x128xi1> to vector<1x128xi32>
    %208 = arith.sitofp %207 : vector<1x128xi32> to vector<1x128xf32>
    %209 = vector.broadcast %208 : vector<1x128xf32> to vector<16x128xf32>
    %210 = arith.mulf %204, %209 : vector<16x128xf32>
    %c127_i32_61 = arith.constant 127 : i32
    %211 = tpu.dynamic_rotate %171 by %c127_i32_61 dim 1 : vector<16x128xf32>, i32 -> vector<16x128xf32>
    %c3_i32_62 = arith.constant 3 : i32
    %212 = vector.broadcast %c3_i32_62 : i32 to vector<1x128xi32>
    %213 = arith.cmpi slt, %176, %212 : vector<1x128xi32>
    %214 = arith.extui %213 : vector<1x128xi1> to vector<1x128xi32>
    %215 = arith.sitofp %214 : vector<1x128xi32> to vector<1x128xf32>
    %216 = vector.broadcast %215 : vector<1x128xf32> to vector<16x128xf32>
    %217 = arith.mulf %211, %216 : vector<16x128xf32>
    %c125_i32 = arith.constant 125 : i32
    %218 = tpu.dynamic_rotate %171 by %c125_i32 dim 1 : vector<16x128xf32>, i32 -> vector<16x128xf32>
    %c12_i32 = arith.constant 12 : i32
    %219 = vector.broadcast %c12_i32 : i32 to vector<1x128xi32>
    %220 = arith.cmpi slt, %174, %219 : vector<1x128xi32>
    %c1_i32_63 = arith.constant 1 : i32
    %221 = vector.broadcast %c1_i32_63 : i32 to vector<1x128xi32>
    %222 = arith.cmpi sge, %176, %221 : vector<1x128xi32>
    %223 = arith.andi %220, %222 : vector<1x128xi1>
    %224 = arith.extui %223 : vector<1x128xi1> to vector<1x128xi32>
    %225 = arith.sitofp %224 : vector<1x128xi32> to vector<1x128xf32>
    %226 = vector.broadcast %225 : vector<1x128xf32> to vector<16x128xf32>
    %227 = arith.mulf %218, %226 : vector<16x128xf32>
    %c124_i32 = arith.constant 124 : i32
    %228 = tpu.dynamic_rotate %171 by %c124_i32 dim 1 : vector<16x128xf32>, i32 -> vector<16x128xf32>
    %c12_i32_64 = arith.constant 12 : i32
    %229 = vector.broadcast %c12_i32_64 : i32 to vector<1x128xi32>
    %230 = arith.cmpi slt, %174, %229 : vector<1x128xi32>
    %231 = arith.extui %230 : vector<1x128xi1> to vector<1x128xi32>
    %232 = arith.sitofp %231 : vector<1x128xi32> to vector<1x128xf32>
    %233 = vector.broadcast %232 : vector<1x128xf32> to vector<16x128xf32>
    %234 = arith.mulf %228, %233 : vector<16x128xf32>
    %c123_i32 = arith.constant 123 : i32
    %235 = tpu.dynamic_rotate %171 by %c123_i32 dim 1 : vector<16x128xf32>, i32 -> vector<16x128xf32>
    %c12_i32_65 = arith.constant 12 : i32
    %236 = vector.broadcast %c12_i32_65 : i32 to vector<1x128xi32>
    %237 = arith.cmpi slt, %174, %236 : vector<1x128xi32>
    %c3_i32_66 = arith.constant 3 : i32
    %238 = vector.broadcast %c3_i32_66 : i32 to vector<1x128xi32>
    %239 = arith.cmpi slt, %176, %238 : vector<1x128xi32>
    %240 = arith.andi %237, %239 : vector<1x128xi1>
    %241 = arith.extui %240 : vector<1x128xi1> to vector<1x128xi32>
    %242 = arith.sitofp %241 : vector<1x128xi32> to vector<1x128xf32>
    %243 = vector.broadcast %242 : vector<1x128xf32> to vector<16x128xf32>
    %244 = arith.mulf %235, %243 : vector<16x128xf32>
    %245 = tpu.concatenate %186, %193, %203, %210, %171, %217, %227, %234, %244 in 0 : vector<16x128xf32>, vector<16x128xf32>, vector<16x128xf32>, vector<16x128xf32>, vector<16x128xf32>, vector<16x128xf32>, vector<16x128xf32>, vector<16x128xf32>, vector<16x128xf32> -> vector<144x128xf32>
    %cst_67 = arith.constant dense<0.000000e+00> : vector<32x128xf32>
    %246 = tpu.matmul %172, %245, %cst_67 {dimension_numbers = #tpu.dot_dimension_numbers<[1], [0], [0], [1], [0, 0, 1, 1], [], []>} : vector<32x144xf32>, vector<144x128xf32>, vector<32x128xf32> -> vector<32x128xf32>
    %247 = vector.broadcast %173 : vector<32x1xf32> to vector<32x128xf32>
    %248 = arith.addf %246, %247 : vector<32x128xf32>
    %cst_68 = arith.constant 0.000000e+00 : f32
    %249 = vector.broadcast %cst_68 : f32 to vector<32x128xf32>
    %250 = arith.maximumf %248, %249 : vector<32x128xf32>
    %c0_69 = arith.constant 0 : index
    %c0_70 = arith.constant 0 : index
    %c0_71 = arith.constant 0 : index
    %251 = vector.load %arg10[%c0_69, %c0_70, %c0_71] : memref<1x32x128xf32, #tpu.memory_space<vmem>>, vector<1x32x128xf32>
    %252 = vector.shape_cast %251 : vector<1x32x128xf32> to vector<32x128xf32>
    %253 = vector.shape_cast %250 : vector<32x128xf32> to vector<1x32x128xf32>
    tpu.vector_store %arg10[%c0_69, %c0_70, %c0_71], %253 {strides = array<i32>} : memref<1x32x128xf32, #tpu.memory_space<vmem>>, vector<1x32x128xf32>,
    return
  }
  func.func @transform_0(%arg0: i32) -> (i32, i32, i32) {
    %c0_i32 = arith.constant 0 : i32
    %c0_i32_0 = arith.constant 0 : i32
    %c0_i32_1 = arith.constant 0 : i32
    return %arg0, %c0_i32, %c0_i32_0 : i32, i32, i32
  }
  func.func @transform_1(%arg0: i32) -> (i32, i32) {
    %c0_i32 = arith.constant 0 : i32
    %c0_i32_0 = arith.constant 0 : i32
    %c0_i32_1 = arith.constant 0 : i32
    return %c0_i32, %c0_i32_0 : i32, i32
  }
  func.func @transform_2(%arg0: i32) -> (i32, i32) {
    %c0_i32 = arith.constant 0 : i32
    %c0_i32_0 = arith.constant 0 : i32
    %c0_i32_1 = arith.constant 0 : i32
    return %c0_i32, %c0_i32_0 : i32, i32
  }
  func.func @transform_3(%arg0: i32) -> (i32, i32) {
    %c0_i32 = arith.constant 0 : i32
    %c0_i32_0 = arith.constant 0 : i32
    %c0_i32_1 = arith.constant 0 : i32
    return %c0_i32, %c0_i32_0 : i32, i32
  }
  func.func @transform_4(%arg0: i32) -> (i32, i32) {
    %c0_i32 = arith.constant 0 : i32
    %c0_i32_0 = arith.constant 0 : i32
    %c0_i32_1 = arith.constant 0 : i32
    return %c0_i32, %c0_i32_0 : i32, i32
  }
  func.func @transform_5(%arg0: i32) -> (i32, i32) {
    %c0_i32 = arith.constant 0 : i32
    %c0_i32_0 = arith.constant 0 : i32
    %c0_i32_1 = arith.constant 0 : i32
    return %c0_i32, %c0_i32_0 : i32, i32
  }
  func.func @transform_6(%arg0: i32) -> (i32, i32) {
    %c0_i32 = arith.constant 0 : i32
    %c0_i32_0 = arith.constant 0 : i32
    %c0_i32_1 = arith.constant 0 : i32
    return %c0_i32, %c0_i32_0 : i32, i32
  }
  func.func @transform_7(%arg0: i32) -> (i32, i32) {
    %c0_i32 = arith.constant 0 : i32
    %c0_i32_0 = arith.constant 0 : i32
    %c0_i32_1 = arith.constant 0 : i32
    return %c0_i32, %c0_i32_0 : i32, i32
  }
  func.func @transform_8(%arg0: i32) -> (i32, i32) {
    %c0_i32 = arith.constant 0 : i32
    %c0_i32_0 = arith.constant 0 : i32
    %c0_i32_1 = arith.constant 0 : i32
    return %c0_i32, %c0_i32_0 : i32, i32
  }
  func.func @transform_9(%arg0: i32) -> (i32, i32, i32) {
    %c0_i32 = arith.constant 0 : i32
    %c0_i32_0 = arith.constant 0 : i32
    %c0_i32_1 = arith.constant 0 : i32
    return %arg0, %c0_i32, %c0_i32_0 : i32, i32, i32
  }
}

</mosaic_0001>

<bundles_post_ra>
// kernel: vgg_forward.1
= control target key start
LH: loop header
LB: loop body
LE: loop exit
PB: predicated region body
PF: predicated region fallthrough
CT: control target
= control target key end

     0   :  { %s1604_s30 = smov 0   ;;  %s2079_s0 = inlined_call_operand.vmem [shape: f32[2,8,256], index: 0, kind: input, shape index: {}]   ;;  %s2080_s1 = inlined_call_operand.vmem [shape: f32[8,72], index: 1, kind: input, shape index: {}]   ;;  %s2081_s2 = inlined_call_operand.vmem [shape: f32[8,1], index: 2, kind: input, shape index: {}]   ;;  %s2082_s3 = inlined_call_operand.vmem [shape: f32[16,72], index: 3, kind: input, shape index: {}]   ;;  %s2083_s4 = inlined_call_operand.vmem [shape: f32[16,1], index: 4, kind: input, shape index: {}]   ;;  %s2084_s5 = inlined_call_operand.vmem [shape: f32[32,144], index: 5, kind: input, shape index: {}]   ;;  %s2085_s6 = inlined_call_operand.vmem [shape: f32[32,1], index: 6, kind: input, shape index: {}]   ;;  %s2086_s7 = inlined_call_operand.vmem [shape: f32[256,128], index: 7, kind: input, shape index: {}]   ;;  %s2087_s8 = inlined_call_operand.vmem [shape: f32[128,128], index: 8, kind: input, shape index: {}]   ;;  %s2088_s9 = inlined_call_operand.vmem [shape: f32[2,32,128], index: 9, kind: output, shape index: {}]  }
   0x1 LB: > { %s1177_s10 = sadd.s32 4294967295, %s1529_s30   ;;  %p1181_p0 = scmp.ge.s32.totalorder %s1529_s30, 1  ;;  %s1529_s30 = sphi %s1604_s30, %s19_s30  }
   0x2   : > { %p287_p1 = scmp.lt.s32.totalorder %s1529_s30, 3 }
   0x4   : > { %p288_p2 = pnand %p1181_p0, %p287_p1 }
   0x5   : > { %p323_p3 = scmp.lt.s32.totalorder (!%p288_p2), %s1177_s10, 1  ;;  %v1531_v0 = vmov (!%p288_p2), 0.0   ;;  %s1532_s15 = smov (!%p288_p2), 16   ;;  %v1538_v3 = vmov (!%p288_p2), 0   ;;  %v336_v4 = vld [vmem:[%s2081_s2] sm:$0xff] (!%p288_p2)  ;;  %v337_v5 = vlaneseq (!%p288_p2)  ;;  %v562_v28 = vld [vmem:[%s2086_s7 + $0x90] sm:$0xff] (!%p288_p2) }
   0x6   : > { %291 = sbr.rel (%p288_p2) target bundleno = 2037 (0x7f5), region = 56  ;;  %535 = vmatprep.mubr.f32.mxu1 (!%p288_p2), %v1531_v0  ;;  %s1533_s16 = smov (!%p288_p2), 17   ;;  %1501 = vset.pattern.permute.xlu0 (!%p288_p2), %v1538_v3  ;;  %v560_v22 = vld [vmem:[%s2086_s7 + $0x80] sm:$0xff] (!%p288_p2) }
   0x7   : > { %s1534_s17 = smov (!%p288_p2), 15   ;;  %s1535_s18 = smov (!%p288_p2), 1   ;;  %1512 = vset.pattern.permute.xlu1 (!%p288_p2), %v1538_v3  ;;  %v1648_v6 = vand.u32 (!%p288_p2), 127, %v337_v5 }
   0x8   : > { %s1536_s19 = smov (!%p288_p2), 127   ;;  %s1537_s20 = smov (!%p288_p2), 113  }
   0x9   : > { %s1539_s21 = smov (!%p288_p2), 112   ;;  %s1540_s22 = smov (!%p288_p2), 111   ;;  %v1651_v7 = vadd.s32 (!%p288_p2), 128, %v1648_v6  ;;  %v340_v8 = vand.u32 (!%p288_p2), 15, %v1648_v6  ;;  %vm349_vm0 = vcmp.ge.s32.totalorder (!%p288_p2), %v1648_v6, 16  ;;  %vm365_vm4 = vcmp.lt.s32.totalorder (!%p288_p2), %v1648_v6, 16 }
   0xa   : > { %vm346_vm5 = vcmp.lt.s32.totalorder (!%p288_p2), %v1648_v6, 17  ;;  %v1188_v14 = vsel (!%p288_p2), %vm349_vm0, 1.0, %v1531_v0  ;;  %vm378_vm7 = vcmp.lt.s32.totalorder (!%p288_p2), %v1648_v6, 15  ;;  %vm395_vm10 = vcmp.lt.s32.totalorder (!%p288_p2), %v1648_v6, 1  ;;  %s1541_s27 = smov (!%p288_p2), 8   ;;  %s1542_s28 = smov (!%p288_p2), 9  }
   0xb   : > { %v341_v9 = vand.u32 (!%p288_p2), 15, %v1651_v7  ;;  %vm1656_vm1 = vcmp.ge.s32.totalorder (!%p288_p2), %v340_v8, 1  ;;  %vm1677_vm6 = vcmp.lt.s32.totalorder (!%p288_p2), %v340_v8, 15  ;;  %vm408_vm11 = vcmp.lt.s32.totalorder (!%p288_p2), %v1648_v6, 127  ;;  %s1544_s12 = smov (!%p288_p2), 121   ;;  %s1545_s13 = smov (!%p288_p2), 119  }
   0xc   : > { %vm353_vm2 = vmand (!%p288_p2), %vm349_vm0, %vm1656_vm1  ;;  %v1191_v32 = vsel (!%p288_p2), %vm1656_vm1, 1.0, %v1531_v0  ;;  %v1193_v45 = vsel (!%p288_p2), %vm1677_vm6, 1.0, %v1531_v0  ;;  %vm425_vm12 = vcmp.lt.s32.totalorder (!%p288_p2), %v1651_v7, 240  ;;  %vm421_vm13 = vcmp.lt.s32.totalorder (!%p288_p2), %v1648_v6, 113  ;;  %s1548_s24 = smov (!%p288_p2), 5   ;;  %s1550_s25 = smov (!%p288_p2), 3  }
   0xd   : > { %s2106_s10 = smov (!%p323_p3, %s1177_s10), 1  ;;  %vm1664_vm3 = vcmp.ge.s32.totalorder %v341_v9, 1  ;;  %v1186_v15 = vsel %vm353_vm2, 1.0, %v1531_v0  ;;  %vm1682_vm8 = vcmp.lt.s32.totalorder %v341_v9, 15  ;;  %vm383_vm9 = vmand %vm349_vm0, %vm1677_vm6  ;;  %vm438_vm15 = vcmp.lt.s32.totalorder %v1648_v6, 112  ;;  %s1551_s26 = smov 125  }
   0xe   : > { %s1225_s11 = sshll.u32 %s2106_s10, 4  ;;  %v1187_v16 = vsel %vm1664_vm3, 1.0, %v1531_v0  ;;  %v1189_v33 = vsel %vm383_vm9, 1.0, %v1531_v0  ;;  %v1190_v34 = vsel %vm1682_vm8, 1.0, %v1531_v0  ;;  %vm427_vm14 = vmand %vm425_vm12, %vm1664_vm3  ;;  %v1197_v60 = vsel %vm425_vm12, 1.0, %v1531_v0 }
   0xf   : > { %s327_s14 = scalar_lea.vmem %s2079_s0, %s1225_s11  ;;  %v1196_v58 = vsel %vm427_vm14, 1.0, %v1531_v0  ;;  %vm455_vm0 = vmand %vm425_vm12, %vm1682_vm8  ;;  %vm451_vm1 = vcmp.lt.s32.totalorder %v1648_v6, 111  ;;  %vm467_vm2 = vcmask 588800   ;;  %vm669_vm3 = vcmp.ge.s32.totalorder %v1648_v6, 8 }
  0x10   : > { %v1619_v1 = vld [vmem:[%s327_s14] sm:$0xff]  ;;  %v1623_v2 = vld [vmem:[%s327_s14 + $0x8] sm:$0xff]  ;;  %v1199_v8 = vsel %vm455_vm0, 1.0, %v1531_v0  ;;  %s1546_s14 = smov 120   ;;  %vm699_vm8 = vcmp.lt.s32.totalorder %v1648_v6, 56  ;;  %vm928_vm12 = vcmp.ge.s32.totalorder %v1648_v6, 4 }
  0x11   : > { %361 = vrot.lane.b32.xlu1 %v1619_v1, %s1532_s15  ;;  %342 = vrot.lane.b32.xlu0 %v1619_v1, %s1533_s16 }
  0x15   : > { %363 = vrot.lane.b32.xlu1 %v1623_v2, %s1532_s15  ;;  %344 = vrot.lane.b32.xlu0 %v1623_v2, %s1533_s16 }
  0x19   : > { %376 = vrot.lane.b32.xlu1 %v1623_v2, %s1534_s17  ;;  %374 = vrot.lane.b32.xlu0 %v1619_v1, %s1534_s17 }
  0x1d   : > { %393 = vrot.lane.b32.xlu1 %v1623_v2, %s1535_s18  ;;  %391 = vrot.lane.b32.xlu0 %v1619_v1, %s1535_s18 }
  0x21   : > { %406 = vrot.lane.b32.xlu1 %v1623_v2, %s1536_s19  ;;  %404 = vrot.lane.b32.xlu0 %v1619_v1, %s1536_s19 }
  0x25   : > { %419 = vrot.lane.b32.xlu1 %v1623_v2, %s1537_s20  ;;  %417 = vrot.lane.b32.xlu0 %v1619_v1, %s1537_s20 }
  0x29   : > { %436 = vrot.lane.b32.xlu1 %v1623_v2, %s1539_s21  ;;  %434 = vrot.lane.b32.xlu0 %v1619_v1, %s1539_s21 }
  0x2d   : > { %449 = vrot.lane.b32.xlu1 %v1623_v2, %s1540_s22  ;;  %447 = vrot.lane.b32.xlu0 %v1619_v1, %s1540_s22 }
  0x31   : > { %464 = vperm.xlu0 %1501, %v336_v4  }
  0x83   : > { %v362_v11 = vpop.permute.xlu1 %361  ;;  %v343_v12 = vpop.permute.xlu0 %342 }
  0x87   : > { %v364_v17 = vpop.permute.xlu1 %363  ;;  %v345_v18 = vpop.permute.xlu0 %344 }
  0x88   : > { %v367_v19 = vsel %vm365_vm4, %v364_v17, %v362_v11  ;;  %v347_v20 = vsel %vm346_vm5, %v343_v12, %v345_v18  ;;  %v348_v21 = vsel %vm346_vm5, %v345_v18, %v343_v12  ;;  %v366_v26 = vsel %vm365_vm4, %v362_v11, %v364_v17 }
  0x89   : > { %v372_v23 = vmul.f32 %v1188_v14, %v367_v19  ;;  %v359_v24 = vmul.f32 %v1186_v15, %v348_v21  ;;  %v360_v25 = vmul.f32 %v1187_v16, %v347_v20 }
  0x8b   : > { %v377_v27 = vpop.permute.xlu1 %376  ;;  %v375_v29 = vpop.permute.xlu0 %374  ;;  %v1347_v30 = vpack.c.bf16 %v366_v26, %v360_v25  ;;  %v1349_v31 = vpack.c.bf16 %v372_v23, %v359_v24  ;;  %v561_v23 = vld [vmem:[%s2086_s7 + $0x88] sm:$0xff]  ;;  %v544_v24 = vld [vmem:[%s2086_s7] sm:$0xff] }
  0x8c   : > { %v379_v35 = vsel %vm378_vm7, %v375_v29, %v377_v27  ;;  %v380_v36 = vsel %vm378_vm7, %v377_v27, %v375_v29  ;;  %v1363_v26 = vpack.c.bf16 %v561_v23, %v560_v22  ;;  %v545_v27 = vld [vmem:[%s2086_s7 + $0x8] sm:$0xff]  ;;  %v563_v29 = vld [vmem:[%s2086_s7 + $0x98] sm:$0xff] }
  0x8d   : > { %1348 = vmatprep.subr.bf16.mxu1 %v1347_v30  ;;  %v389_v41 = vmul.f32 %v1189_v33, %v380_v36  ;;  %v390_v42 = vmul.f32 %v1190_v34, %v379_v35  ;;  %v546_v33 = vld [vmem:[%s2086_s7 + $0x10] sm:$0xff]  ;;  %v564_v35 = vld [vmem:[%s2086_s7 + $0xa0] sm:$0xff]  ;;  %v565_v36 = vld [vmem:[%s2086_s7 + $0xa8] sm:$0xff] }
  0x8e   : > { %1350 = vmatpush1.bf16.msra.mxu1 %v1349_v31  ;;  %v1365_v31 = vpack.c.bf16 %v545_v27, %v544_v24 }
  0x8f   : > { %v394_v37 = vpop.permute.xlu1 %393  ;;  %v392_v38 = vpop.permute.xlu0 %391 }
  0x90   : > { %v396_v39 = vsel %vm395_vm10, %v392_v38, %v394_v37  ;;  %v397_v40 = vsel %vm395_vm10, %v394_v37, %v392_v38 }
  0x91   : > { %v402_v43 = vmul.f32 %v1191_v32, %v397_v40  ;;  %v403_v44 = vmul.f32 %v1187_v16, %v396_v39  ;;  %v335_v16 = vld [vmem:[%s2080_s1] sm:$0xff]  ;;  %v1371_v39 = vpack.c.bf16 %v565_v36, %v564_v35  ;;  %v1202_v35 = vsel %vm669_vm3, 1.0, %v1531_v0 }
  0x92   : > { %v548_v40 = vld [vmem:[%s2086_s7 + $0x20] sm:$0xff] }
  0x93   : > { %v407_v46 = vpop.permute.xlu1 %406  ;;  %v405_v47 = vpop.permute.xlu0 %404  ;;  %v1351_v48 = vpack.c.bf16 %v403_v44, %v390_v42  ;;  %v1353_v49 = vpack.c.bf16 %v402_v43, %v389_v41  ;;  %v549_v41 = vld [vmem:[%s2086_s7 + $0x28] sm:$0xff]  ;;  %v566_v42 = vld [vmem:[%s2086_s7 + $0xb0] sm:$0xff]  ;;  %v567_v43 = vld [vmem:[%s2086_s7 + $0xb8] sm:$0xff] }
  0x94   : > { %v409_v50 = vsel %vm408_vm11, %v405_v47, %v407_v46  ;;  %v410_v51 = vsel %vm408_vm11, %v407_v46, %v405_v47  ;;  %v1373_v44 = vpack.c.bf16 %v549_v41, %v548_v40  ;;  %v550_v46 = vld [vmem:[%s2086_s7 + $0x30] sm:$0xff]  ;;  %v551_v47 = vld [vmem:[%s2086_s7 + $0x38] sm:$0xff] }
  0x95   : > { %v415_v52 = vmul.f32 %v1193_v45, %v409_v50  ;;  %v416_v53 = vmul.f32 %v1190_v34, %v410_v51  ;;  %1352 = vmatprep.subr.bf16.mxu1 %v1351_v48  ;;  %v547_v34 = vld [vmem:[%s2086_s7 + $0x18] sm:$0xff]  ;;  %v568_v48 = vld [vmem:[%s2086_s7 + $0xc0] sm:$0xff]  ;;  %v1377_v50 = vpack.c.bf16 %v551_v47, %v550_v46 }
  0x96   : > { %1354 = vmatpush1.bf16.msra.mxu1 %v1353_v49  ;;  %v1369_v38 = vpack.c.bf16 %v547_v34, %v546_v33  ;;  %v569_v49 = vld [vmem:[%s2086_s7 + $0xc8] sm:$0xff]  ;;  %v823_v33 = vld [vmem:[%s2087_s8 + $0x78] sm:$0xff] }
  0x97   : > { %v420_v54 = vpop.permute.xlu1 %419  ;;  %v418_v55 = vpop.permute.xlu0 %417  ;;  %v1355_v56 = vpack.c.bf16 %v416_v53, %v1623_v2  ;;  %v1357_v57 = vpack.c.bf16 %v415_v52, %v1619_v1  ;;  %v1379_v51 = vpack.c.bf16 %v569_v49, %v568_v48  ;;  %v552_v52 = vld [vmem:[%s2086_s7 + $0x40] sm:$0xff]  ;;  %v553_v53 = vld [vmem:[%s2086_s7 + $0x48] sm:$0xff] }
  0x98   : > { %v423_v59 = vsel %vm421_vm13, %v420_v54, %v418_v55  ;;  %v422_v61 = vsel %vm421_vm13, %v418_v55, %v420_v54  ;;  %v570_v54 = vld [vmem:[%s2086_s7 + $0xd0] sm:$0xff]  ;;  %v571_v55 = vld [vmem:[%s2086_s7 + $0xd8] sm:$0xff] }
  0x99   : > { %1356 = vmatprep.subr.bf16.mxu1 %v1355_v56  ;;  %v433_v2 = vmul.f32 %v1196_v58, %v423_v59  ;;  %v432_v5 = vmul.f32 %v1191_v32, %v422_v61  ;;  %v1367_v32 = vpack.c.bf16 %v563_v29, %v562_v28  ;;  %v1381_v56 = vpack.c.bf16 %v553_v53, %v552_v52  ;;  %v554_v58 = vld [vmem:[%s2086_s7 + $0x50] sm:$0xff]  ;;  %v555_v59 = vld [vmem:[%s2086_s7 + $0x58] sm:$0xff]  ;;  %v573_v61 = vld [vmem:[%s2086_s7 + $0xe8] sm:$0xff] }
  0x9a   : > { %1358 = vmatpush1.bf16.msra.mxu1 %v1357_v57  ;;  %v1383_v57 = vpack.c.bf16 %v571_v55, %v570_v54  ;;  %v662_v29 = vld [vmem:[%s2082_s3] sm:$0xff]  ;;  %v1207_v54 = vsel %vm699_vm8, 1.0, %v1531_v0 }
  0x9b   : > { %v437_v62 = vpop.permute.xlu1 %436  ;;  %v435_v63 = vpop.permute.xlu0 %434  ;;  %1309 = vmatprep.mubr.msk.f32.mxu0 %vm467_vm2, %v662_v29  ;;  %v820_v29 = vld [vmem:[%s2087_s8 + $0x60] sm:$0xff] }
  0x9c   : > { %v440_v1 = vsel %vm438_vm15, %v437_v62, %v435_v63  ;;  %v439_v3 = vsel %vm438_vm15, %v435_v63, %v437_v62  ;;  %v1385_v62 = vpack.c.bf16 %v555_v59, %v554_v58 }
  0x9d   : > { %v446_v4 = vmul.f32 %v1197_v60, %v440_v1  ;;  %v1361_v12 = vpack.c.bf16 %v439_v3, %v432_v5  ;;  %v572_v60 = vld [vmem:[%s2086_s7 + $0xe0] sm:$0xff]  ;;  %v575_v5 = vld [vmem:[%s2086_s7 + $0xf8] sm:$0xff] }
  0x9e   : > { %v1387_v63 = vpack.c.bf16 %v573_v61, %v572_v60  ;;  %v556_v1 = vld [vmem:[%s2086_s7 + $0x60] sm:$0xff] }
  0x9f   : > { %v450_v9 = vpop.permute.xlu1 %449  ;;  %v1359_v10 = vpack.c.bf16 %v446_v4, %v433_v2  ;;  %v448_v11 = vpop.permute.xlu0 %447  ;;  %v557_v2 = vld [vmem:[%s2086_s7 + $0x68] sm:$0xff]  ;;  %v574_v4 = vld [vmem:[%s2086_s7 + $0xf0] sm:$0xff] }
  0xa0   : > { %v452_v13 = vsel %vm451_vm1, %v448_v11, %v450_v9  ;;  %v453_v7 = vsel %vm451_vm1, %v450_v9, %v448_v11  ;;  %v1389_v3 = vpack.c.bf16 %v557_v2, %v556_v1  ;;  %v558_v9 = vld [vmem:[%s2086_s7 + $0x70] sm:$0xff]  ;;  %vm973_vm1 = vcmp.lt.s32.totalorder %v1648_v6, 12 }
  0xa1   : > { %1360 = vmatprep.subr.bf16.mxu1 %v1359_v10  ;;  %v461_v14 = vmul.f32 %v1199_v8, %v453_v7  ;;  %v460_v15 = vmul.f32 %v1193_v45, %v452_v13  ;;  %v1375_v45 = vpack.c.bf16 %v567_v43, %v566_v42  ;;  %v1391_v8 = vpack.c.bf16 %v575_v5, %v574_v4  ;;  %v559_v10 = vld [vmem:[%s2086_s7 + $0x78] sm:$0xff] }
  0xa2   : > { %1362 = vmatpush1.bf16.msra.mxu1 %v1361_v12  ;;  %v1393_v11 = vpack.c.bf16 %v559_v10, %v558_v9  ;;  %v809_v9 = vld [vmem:[%s2087_s8 + $0x8] sm:$0xff]  ;;  %v810_v10 = vld [vmem:[%s2087_s8 + $0x10] sm:$0xff] }
  0xa3   : > { %487 = vmatprep.subr.mxu1 %v461_v14 }
  0xa6   : > { %488 = vmatpush1.msra.mxu1 %v460_v15 }
  0xa7   : > { %1200 = vmatmul.mubr.msk.f32.vlgmr.msra.gmra.mrb[0].mxu1 %vm467_vm2, %v335_v16  ;;  %1364 = vmatprep.subr.bf16.mxu1 %v1363_v26 }
  0xa8   : > { %1366 = vmatpush3.bf16.msra.mxu1 %v1365_v31  ;;  %v665_v31 = vld [vmem:[%s2083_s4 + $0x8] sm:$0xff] }
  0xa9   : > { %1368 = vmatprep.subr.bf16.mxu1 %v1367_v32  ;;  %v666_v32 = vand.u32 7, %v1648_v6 }
  0xab   : > { %vm1868_vm4 = vcmp.ge.s32.totalorder %v666_v32, 1  ;;  %vm1874_vm6 = vcmp.lt.s32.totalorder %v666_v32, 7  ;;  %v822_v32 = vld [vmem:[%s2087_s8 + $0x70] sm:$0xff] }
  0xac   : > { %1370 = vmatpush3.bf16.msra.mxu1 %v1369_v38  ;;  %vm671_vm5 = vmand %vm669_vm3, %vm1868_vm4  ;;  %v1204_v41 = vsel %vm1868_vm4, 1.0, %v1531_v0  ;;  %v1205_v48 = vsel %vm1874_vm6, 1.0, %v1531_v0  ;;  %v1439_v34 = vpack.c.bf16 %v823_v33, %v822_v32  ;;  %v1217_v32 = vsel %vm973_vm1, 1.0, %v1531_v0 }
  0xad   : > { %1372 = vmatprep.subr.bf16.mxu1 %v1371_v39  ;;  %v1201_v36 = vsel %vm671_vm5, 1.0, %v1531_v0  ;;  %vm683_vm7 = vmand %vm669_vm3, %vm1874_vm6 }
  0xae   : > { %v1203_v42 = vsel %vm683_vm7, 1.0, %v1531_v0  ;;  %vm700_vm9 = vmand %vm699_vm8, %vm1868_vm4 }
  0xaf   : > { %v1206_v53 = vsel %vm700_vm9, 1.0, %v1531_v0  ;;  %vm711_vm10 = vmand %vm699_vm8, %vm1874_vm6 }
  0xb0   : > { %v465_v17 = vpop.permute.xlu0 %464  ;;  %1374 = vmatpush3.bf16.msra.mxu1 %v1373_v44  ;;  %v1208_v59 = vsel %vm711_vm10, 1.0, %v1531_v0 }
  0xb1   : > { %1376 = vmatprep.subr.bf16.mxu1 %v1375_v45 }
  0xb4   : > { %1378 = vmatpush3.bf16.msra.mxu1 %v1377_v50 }
  0xb5   : > { %1380 = vmatprep.subr.bf16.mxu1 %v1379_v51 }
  0xb8   : > { %1382 = vmatpush3.bf16.msra.mxu1 %v1381_v56 }
  0xb9   : > { %1384 = vmatprep.subr.bf16.mxu1 %v1383_v57 }
  0xbc   : > { %1386 = vmatpush3.bf16.msra.mxu1 %v1385_v62 }
  0xbd   : > { %1388 = vmatprep.subr.bf16.mxu1 %v1387_v63  ;;  %v663_v63 = vld [vmem:[%s2082_s3 + $0x8] sm:$0xff] }
  0xc0   : > { %1390 = vmatpush3.bf16.msra.mxu1 %v1389_v3 }
  0xc1   : > { %1392 = vmatprep.subr.bf16.mxu1 %v1391_v8  ;;  %v808_v8 = vld [vmem:[%s2087_s8] sm:$0xff] }
  0xc4   : > { %1394 = vmatpush3.bf16.msra.mxu1 %v1393_v11 }
 0x17a   : > { %v537_v18 = vpop.f32.mrb[0].mxu1 }
 0x17b   : > { %v1733_v19 = vadd.f32 %v537_v18, %v465_v17  ;;  %v539_v20 = vpop.f32.mrb[1].mxu1 }
 0x17c   : > { %v1735_v21 = vadd.f32 %v539_v20, %v465_v17 }
 0x17d   : > { %v542_v25 = vmax.f32 %v1733_v19, 0.0 }
 0x17e   : > { %v543_v30 = vmax.f32 %v1735_v21, 0.0 }
 0x180   : > { %v1502_v37 = vpack.i.bf16 %v543_v30, %v542_v25 }
 0x182   : > { %1503 = vrot.lane.b32.xlu1 %v1502_v37, %s1536_s19 }
 0x1f4   : > { %v1504_v12 = vpop.permute.xlu1 %1503 }
 0x1f5   : > { %v1506_v13 = vunpack.i.h.bf16 %v1504_v12  ;;  %v1505_v7 = vunpack.i.l.bf16 %v1504_v12  ;;  %v1411_v12 = vpack.c.bf16 %v809_v9, %v808_v8 }
 0x1f7   : > { %v580_v14 = vsel %vm408_vm11, %v1505_v7, %v1506_v13  ;;  %v581_v15 = vsel %vm408_vm11, %v1506_v13, %v1505_v7  ;;  %v811_v13 = vld [vmem:[%s2087_s8 + $0x18] sm:$0xff]  ;;  %1412 = vmatprep.subr.bf16.mxu1 %v1411_v12  ;;  %vm1016_vm11 = vcmask 130048  }
 0x1f8   : > { %v582_v16 = vmax.f32 %v542_v25, %v580_v14  ;;  %v583_v17 = vmax.f32 %v543_v30, %v581_v15  ;;  %v664_v30 = vld [vmem:[%s2083_s4] sm:$0xff]  ;;  %v1415_v14 = vpack.c.bf16 %v811_v13, %v810_v10 }
 0x1f9   : > { %v812_v15 = vld [vmem:[%s2087_s8 + $0x20] sm:$0xff] }
 0x1fa   : > { %v1507_v18 = vpack.i.bf16 %v583_v17, %v582_v16 }
 0x1fc   : > { %1508 = vrot.lane.b32.xlu1 %v1507_v18, %s1539_s21  ;;  %s1543_s21 = smov 7  }
 0x26e   : > { %v1509_v20 = vpop.permute.xlu1 %1508 }
 0x26f   : > { %v1511_v22 = vunpack.i.h.bf16 %v1509_v20  ;;  %v1510_v23 = vunpack.i.l.bf16 %v1509_v20 }
 0x271   : > { %v588_v24 = vsel %vm438_vm15, %v1510_v23, %v1511_v22  ;;  %v589_v26 = vsel %vm438_vm15, %v1511_v22, %v1510_v23  ;;  %v814_v22 = vld [vmem:[%s2087_s8 + $0x30] sm:$0xff]  ;;  %v815_v23 = vld [vmem:[%s2087_s8 + $0x38] sm:$0xff] }
 0x272   : > { %v590_v27 = vmax.f32 %v582_v16, %v588_v24  ;;  %v591_v28 = vmax.f32 %v583_v17, %v589_v26  ;;  %v813_v16 = vld [vmem:[%s2087_s8 + $0x28] sm:$0xff]  ;;  %v1423_v24 = vpack.c.bf16 %v815_v23, %v814_v22  ;;  %v816_v26 = vld [vmem:[%s2087_s8 + $0x40] sm:$0xff] }
 0x273   : > { %v1419_v20 = vpack.c.bf16 %v813_v16, %v812_v15 }
 0x274   : > { %656 = vmatprep.mubr.f32.mxu1 %v591_v28 }
 0x275   : > { %657 = vmatmul.mubr.f32.vlgmr.msra.gmra.mrb[2].mxu1 %v590_v27  ;;  %v817_v27 = vld [vmem:[%s2087_s8 + $0x48] sm:$0xff] }
 0x276   : > { %1414 = vmatpush3.bf16.msra.mxu1 %v1411_v12  ;;  %v1427_v28 = vpack.c.bf16 %v817_v27, %v816_v26 }
 0x277   : > { %1416 = vmatprep.subr.bf16.mxu1 %v1415_v14 }
 0x27a   : > { %1418 = vmatpush3.bf16.msra.mxu1 %v1415_v14 }
 0x27b   : > { %1420 = vmatprep.subr.bf16.mxu1 %v1419_v20 }
 0x27e   : > { %1422 = vmatpush3.bf16.msra.mxu1 %v1419_v20 }
 0x27f   : > { %1424 = vmatprep.subr.bf16.mxu1 %v1423_v24 }
 0x282   : > { %1426 = vmatpush3.bf16.msra.mxu1 %v1423_v24 }
 0x283   : > { %1428 = vmatprep.subr.bf16.mxu1 %v1427_v28 }
 0x286   : > { %1430 = vmatpush3.bf16.msra.mxu1 %v1427_v28 }
 0x348   : > { %v1259_v19 = vpop.f32.mrb[2].mxu1 }
 0x349   : > { %v1260_v25 = vpop.f32.mrb[3].mxu1 }
 0x34a   : > { %v1261_v21 = vadd.f32 %v1260_v25, %v1259_v19  ;;  %v818_v19 = vld [vmem:[%s2087_s8 + $0x50] sm:$0xff]  ;;  %v819_v25 = vld [vmem:[%s2087_s8 + $0x58] sm:$0xff] }
 0x34c   : > { %675 = vrot.lane.b32.xlu1 %v1261_v21, %s1541_s27  ;;  %667 = vrot.lane.b32.xlu0 %v1261_v21, %s1542_s28  ;;  %s1552_s27 = smov 124  }
 0x350   : > { %687 = vrot.lane.b32.xlu1 %v1261_v21, %s1535_s18  ;;  %680 = vrot.lane.b32.xlu0 %v1261_v21, %s1543_s21 }
 0x354   : > { %697 = vrot.lane.b32.xlu1 %v1261_v21, %s1544_s12  ;;  %692 = vrot.lane.b32.xlu0 %v1261_v21, %s1536_s19  ;;  %s1226_s12 = sshll.u32 %s2106_s10, 5 }
 0x355   : > { %s332_s16 = scalar_lea.vmem %s2088_s9, %s1226_s12 }
 0x358   : > { %709 = vrot.lane.b32.xlu1 %v1261_v21, %s1545_s13  ;;  %704 = vrot.lane.b32.xlu0 %v1261_v21, %s1546_s14 }
 0x35c   : > { %717 = vperm.xlu0 %1501, %v664_v30   ;;  %722 = vperm.xlu1 %1512, %v665_v31   ;;  %v821_v30 = vld [vmem:[%s2087_s8 + $0x68] sm:$0xff] }
 0x35d   : > { %v1435_v31 = vpack.c.bf16 %v821_v30, %v820_v29 }
 0x3be   : > { %v676_v37 = vpop.permute.xlu1 %675  ;;  %v668_v38 = vpop.permute.xlu0 %667 }
 0x3bf   : > { %v679_v39 = vmul.f32 %v1202_v35, %v676_v37  ;;  %v674_v40 = vmul.f32 %v1201_v36, %v668_v38 }
 0x3c1   : > { %v1395_v43 = vpack.c.bf16 %v679_v39, %v674_v40 }
 0x3c2   : > { %v688_v44 = vpop.permute.xlu1 %687  ;;  %v681_v45 = vpop.permute.xlu0 %680 }
 0x3c3   : > { %v691_v46 = vmul.f32 %v1204_v41, %v688_v44  ;;  %v686_v47 = vmul.f32 %v1203_v42, %v681_v45  ;;  %1396 = vmatprep.subr.bf16.mxu0 %v1395_v43 }
 0x3c4   : > { %1398 = vmatpush3.bf16.msra.mxu0 %v1395_v43 }
 0x3c5   : > { %v1399_v49 = vpack.c.bf16 %v691_v46, %v686_v47  ;;  %v1547_v46 = vmov 0.0|0.0  }
 0x3c6   : > { %v698_v50 = vpop.permute.xlu1 %697  ;;  %v693_v51 = vpop.permute.xlu0 %692 }
 0x3c7   : > { %v696_v52 = vmul.f32 %v1205_v48, %v693_v51  ;;  %1400 = vmatprep.subr.bf16.mxu0 %v1399_v49  ;;  %v703_v57 = vmul.f32 %v1206_v53, %v698_v50  ;;  %v912_v50 = vld [vmem:[%s2084_s5 + $0x8] sm:$0xff]  ;;  %v922_v53 = vld [vmem:[%s2085_s6 + $0x18] sm:$0xff] }
 0x3c8   : > { %1402 = vmatpush3.bf16.msra.mxu0 %v1399_v49  ;;  %v920_v51 = vld [vmem:[%s2085_s6 + $0x8] sm:$0xff] }
 0x3c9   : > { %v1403_v55 = vpack.c.bf16 %v696_v52, %v1261_v21  ;;  %v1431_v21 = vpack.c.bf16 %v819_v25, %v818_v19  ;;  %v919_v52 = vld [vmem:[%s2085_s6] sm:$0xff] }
 0x3ca   : > { %v705_v56 = vpop.permute.xlu0 %704  ;;  %v710_v60 = vpop.permute.xlu1 %709 }
 0x3cb   : > { %v708_v58 = vmul.f32 %v1207_v54, %v705_v56  ;;  %1404 = vmatprep.subr.bf16.mxu0 %v1403_v55  ;;  %v714_v62 = vmul.f32 %v1208_v59, %v710_v60  ;;  %1432 = vmatprep.subr.bf16.mxu1 %v1431_v21  ;;  %v921_v54 = vld [vmem:[%s2085_s6 + $0x10] sm:$0xff] }
 0x3cc   : > { %1406 = vmatpush3.bf16.msra.mxu0 %v1403_v55  ;;  %1434 = vmatpush3.bf16.msra.mxu1 %v1431_v21  ;;  %v923_v55 = vand.u32 3, %v1648_v6 }
 0x3cd   : > { %v1407_v61 = vpack.c.bf16 %v708_v58, %v703_v57  ;;  %1436 = vmatprep.subr.bf16.mxu1 %v1435_v31 }
 0x3ce   : > { %vm2002_vm13 = vcmp.ge.s32.totalorder %v923_v55, 1  ;;  %vm2009_vm15 = vcmp.lt.s32.totalorder %v923_v55, 3 }
 0x3cf   : > { %1408 = vmatprep.subr.bf16.mxu0 %v1407_v61  ;;  %vm930_vm14 = vmand %vm928_vm12, %vm2002_vm13  ;;  %v1215_v23 = vsel %vm2009_vm15, 1.0, %v1531_v0 }
 0x3d0   : > { %1410 = vmatpush3.bf16.msra.mxu0 %v1407_v61  ;;  %1438 = vmatpush3.bf16.msra.mxu1 %v1435_v31  ;;  %v1211_v57 = vsel %vm930_vm14, 1.0, %v1531_v0  ;;  %vm948_vm0 = vmand %vm928_vm12, %vm2009_vm15 }
 0x3d1   : > { %1307 = vmatprep.subr.mxu0 %v714_v62  ;;  %1440 = vmatprep.subr.bf16.mxu1 %v1439_v34  ;;  %v1213_v8 = vsel %vm948_vm0, 1.0, %v1531_v0  ;;  %vm991_vm3 = vmand %vm973_vm1, %vm2009_vm15 }
 0x3d4   : > { %1308 = vmatpush3.msra.mxu0 %v714_v62  ;;  %1442 = vmatpush3.bf16.msra.mxu1 %v1439_v34 }
 0x3d5   : > { %1310 = vmatmul.mubr.msk.f32.vlgmr.msra.gmra.mrb[0].mxu0 %vm467_vm2, %v663_v63  ;;  %1443 = vmatprep.subr.bf16.mxu0 %v1547_v46  ;;  %v1212_v63 = vsel %vm928_vm12, 1.0, %v1531_v0  ;;  %vm974_vm2 = vmand %vm973_vm1, %vm2002_vm13 }
 0x3d6   : > { %1219 = vmatprep.mubr.msk.f32.mxu0 %vm1016_vm11, %v912_v50  ;;  %v1216_v19 = vsel %vm974_vm2, 1.0, %v1531_v0 }
 0x3db   : > { %v723_v1 = vpop.permute.xlu1 %722  ;;  %v718_v3 = vpop.permute.xlu0 %717 }
 0x4a8   : > { %v1311_v2 = vpop.f32.mrb[0].mxu0 }
 0x4a9   : > { %v803_v4 = vadd.f32 %v1311_v2, %v723_v1  ;;  %v797_v5 = vpop.f32.mrb[1].mxu0 }
 0x4aa   : > { %v798_v11 = vadd.f32 %v797_v5, %v718_v3 }
 0x4ab   : > { %v807_v7 = vmax.f32 %v803_v4, 0.0 }
 0x4ac   : > { %v806_v17 = vmax.f32 %v798_v11, 0.0 }
 0x4ae   : > { %v1513_v18 = vpack.i.bf16 %v807_v7, %v806_v17 }
 0x4b0   : > { %1514 = vrot.lane.b32.xlu0 %v1513_v18, %s1536_s19 }
 0x522   : > { %v1515_v35 = vpop.permute.xlu0 %1514 }
 0x523   : > { %v1517_v36 = vunpack.i.h.bf16 %v1515_v35  ;;  %v1516_v37 = vunpack.i.l.bf16 %v1515_v35 }
 0x525   : > { %v829_v38 = vmax.f32 %v807_v7, %v1517_v36  ;;  %v828_v39 = vmax.f32 %v806_v17, %v1516_v37  ;;  %v1214_v7 = vsel %vm2002_vm13, 1.0, %v1531_v0  ;;  %v1218_v37 = vsel %vm991_vm3, 1.0, %v1531_v0  ;;  %v914_v0 = vld [vmem:[%s2084_s5 + $0x18] sm:$0xff] }
 0x527   : > { %v1518_v40 = vpack.i.bf16 %v829_v38, %v828_v39 }
 0x529   : > { %1519 = vrot.lane.b32.xlu1 %v1518_v40, %s1546_s14  ;;  %s1549_s14 = smov 4  }
 0x59b   : > { %v1520_v41 = vpop.permute.xlu1 %1519 }
 0x59c   : > { %v1522_v42 = vunpack.i.h.bf16 %v1520_v41  ;;  %v1521_v43 = vunpack.i.l.bf16 %v1520_v41 }
 0x59e   : > { %v835_v44 = vmax.f32 %v829_v38, %v1522_v42  ;;  %v834_v45 = vmax.f32 %v828_v39, %v1521_v43  ;;  %v911_v43 = vld [vmem:[%s2084_s5] sm:$0xff] }
 0x5a0   : > { %1344 = vmatprep.mubr.f32.mxu1 %v834_v45  ;;  %v916_v45 = vld [vmem:[%s2084_s5 + $0x28] sm:$0xff] }
 0x5a1   : > { %1345 = vmatmul.mubr.f32.vlgmr.msra.gmra.mrb[4].mxu1 %v835_v44  ;;  %v913_v44 = vld [vmem:[%s2084_s5 + $0x10] sm:$0xff] }
 0x674   : > { %v1958_v47 = vpop.f32.mrb[4].mxu1 }
 0x675   : > { %926 = vrot.lane.b32.xlu1 %v1958_v47, %s1548_s24  ;;  %v1961_v48 = vpop.f32.mrb[5].mxu1 }
 0x676   : > { %924 = vrot.lane.b32.xlu0 %v1961_v48, %s1548_s24  ;;  %v1456_v49 = vpack.c.bf16 %v1958_v47, %v1961_v48 }
 0x679   : > { %937 = vrot.lane.b32.xlu1 %v1958_v47, %s1549_s14 }
 0x67a   : > { %935 = vrot.lane.b32.xlu0 %v1961_v48, %s1549_s14 }
 0x67d   : > { %945 = vrot.lane.b32.xlu1 %v1958_v47, %s1550_s25 }
 0x67e   : > { %943 = vrot.lane.b32.xlu0 %v1961_v48, %s1550_s25 }
 0x681   : > { %955 = vrot.lane.b32.xlu1 %v1958_v47, %s1535_s18 }
 0x682   : > { %953 = vrot.lane.b32.xlu0 %v1961_v48, %s1535_s18  ;;  %s1553_s18 = smov 123  }
 0x685   : > { %963 = vrot.lane.b32.xlu1 %v1958_v47, %s1536_s19 }
 0x686   : > { %961 = vrot.lane.b32.xlu0 %v1961_v48, %s1536_s19 }
 0x689   : > { %971 = vrot.lane.b32.xlu1 %v1958_v47, %s1551_s26 }
 0x68a   : > { %969 = vrot.lane.b32.xlu0 %v1961_v48, %s1551_s26 }
 0x68d   : > { %981 = vrot.lane.b32.xlu1 %v1958_v47, %s1552_s27 }
 0x68e   : > { %979 = vrot.lane.b32.xlu0 %v1961_v48, %s1552_s27 }
 0x691   : > { %989 = vrot.lane.b32.xlu1 %v1958_v47, %s1553_s18  ;;  %v918_v47 = vld [vmem:[%s2084_s5 + $0x38] sm:$0xff] }
 0x692   : > { %987 = vrot.lane.b32.xlu0 %v1961_v48, %s1553_s18  ;;  %v917_v48 = vld [vmem:[%s2084_s5 + $0x30] sm:$0xff] }
 0x695   : > { %1003 = vperm.xlu1 %1512, %v920_v51  }
 0x696   : > { %998 = vperm.xlu0 %1501, %v919_v52  }
 0x699   : > { %1013 = vperm.xlu1 %1512, %v922_v53  }
 0x69a   : > { %1008 = vperm.xlu0 %1501, %v921_v54  }
 0x6e7   : > { %v927_v58 = vpop.permute.xlu1 %926 }
 0x6e8   : > { %v934_v60 = vmul.f32 %v1211_v57, %v927_v58  ;;  %v925_v61 = vpop.permute.xlu0 %924 }
 0x6e9   : > { %v933_v62 = vmul.f32 %v1211_v57, %v925_v61 }
 0x6eb   : > { %v1444_v1 = vpack.c.bf16 %v934_v60, %v933_v62  ;;  %v938_v2 = vpop.permute.xlu1 %937 }
 0x6ec   : > { %v942_v3 = vmul.f32 %v1212_v63, %v938_v2  ;;  %v936_v4 = vpop.permute.xlu0 %935 }
 0x6ed   : > { %v941_v5 = vmul.f32 %v1212_v63, %v936_v4  ;;  %1445 = vmatpush1.bf16.msra.mxu0 %v1444_v1 }
 0x6ee   : > { %1446 = vmatprep.subr.bf16.mxu0 %v1547_v46 }
 0x6ef   : > { %v1447_v9 = vpack.c.bf16 %v942_v3, %v941_v5  ;;  %v946_v10 = vpop.permute.xlu1 %945 }
 0x6f0   : > { %v952_v11 = vmul.f32 %v1213_v8, %v946_v10  ;;  %v944_v12 = vpop.permute.xlu0 %943 }
 0x6f1   : > { %v951_v13 = vmul.f32 %v1213_v8, %v944_v12  ;;  %1448 = vmatpush1.bf16.msra.mxu0 %v1447_v9 }
 0x6f2   : > { %1449 = vmatprep.subr.bf16.mxu0 %v1547_v46 }
 0x6f3   : > { %v1450_v14 = vpack.c.bf16 %v952_v11, %v951_v13  ;;  %v956_v15 = vpop.permute.xlu1 %955 }
 0x6f4   : > { %v960_v16 = vmul.f32 %v1214_v7, %v956_v15  ;;  %v954_v17 = vpop.permute.xlu0 %953 }
 0x6f5   : > { %v959_v18 = vmul.f32 %v1214_v7, %v954_v17  ;;  %1451 = vmatpush1.bf16.msra.mxu0 %v1450_v14 }
 0x6f6   : > { %1452 = vmatprep.subr.bf16.mxu0 %v1547_v46 }
 0x6f7   : > { %v1453_v20 = vpack.c.bf16 %v960_v16, %v959_v18  ;;  %v964_v22 = vpop.permute.xlu1 %963 }
 0x6f8   : > { %v962_v24 = vpop.permute.xlu0 %961  ;;  %v968_v26 = vmul.f32 %v1215_v23, %v964_v22 }
 0x6f9   : > { %1454 = vmatpush1.bf16.msra.mxu0 %v1453_v20  ;;  %v967_v27 = vmul.f32 %v1215_v23, %v962_v24 }
 0x6fa   : > { %1455 = vmatprep.subr.bf16.mxu0 %v1547_v46 }
 0x6fb   : > { %v972_v28 = vpop.permute.xlu1 %971  ;;  %v1459_v21 = vpack.c.bf16 %v968_v26, %v967_v27 }
 0x6fc   : > { %v970_v25 = vpop.permute.xlu0 %969  ;;  %v978_v29 = vmul.f32 %v1216_v19, %v972_v28 }
 0x6fd   : > { %1457 = vmatpush1.bf16.msra.mxu0 %v1456_v49  ;;  %v977_v30 = vmul.f32 %v1216_v19, %v970_v25 }
 0x6fe   : > { %1458 = vmatprep.subr.bf16.mxu0 %v1547_v46 }
 0x6ff   : > { %v982_v31 = vpop.permute.xlu1 %981  ;;  %v1462_v34 = vpack.c.bf16 %v978_v29, %v977_v30 }
 0x700   : > { %v980_v33 = vpop.permute.xlu0 %979  ;;  %v986_v35 = vmul.f32 %v1217_v32, %v982_v31 }
 0x701   : > { %1460 = vmatpush1.bf16.msra.mxu0 %v1459_v21  ;;  %v985_v36 = vmul.f32 %v1217_v32, %v980_v33 }
 0x702   : > { %1461 = vmatprep.subr.bf16.mxu0 %v1547_v46 }
 0x703   : > { %v990_v38 = vpop.permute.xlu1 %989  ;;  %v1465_v40 = vpack.c.bf16 %v986_v35, %v985_v36 }
 0x704   : > { %v988_v39 = vpop.permute.xlu0 %987  ;;  %v995_v41 = vmul.f32 %v1218_v37, %v990_v38 }
 0x705   : > { %1463 = vmatpush1.bf16.msra.mxu0 %v1462_v34  ;;  %v994_v42 = vmul.f32 %v1218_v37, %v988_v39 }
 0x706   : > { %1464 = vmatprep.subr.bf16.mxu0 %v1547_v46 }
 0x707   : > { %v1468_v6 = vpack.c.bf16 %v995_v41, %v994_v42 }
 0x709   : > { %1466 = vmatpush1.bf16.msra.mxu0 %v1465_v40 }
 0x70a   : > { %1467 = vmatprep.subr.bf16.mxu0 %v1547_v46  ;;  %v915_v46 = vld [vmem:[%s2084_s5 + $0x20] sm:$0xff] }
 0x70d   : > { %1469 = vmatpush1.bf16.msra.mxu0 %v1468_v6 }
 0x710   : > { %1094 = vmatmul.mubr.f32.vlgmr.msra.gmra.mrb[2].mxu0 %v911_v43 }
 0x711   : > { %1220 = vmatprep.mubr.msk.f32.mxu0 %vm1016_vm11, %v914_v0 }
 0x714   : > { %1099 = vmatmul.mubr.f32.gmra.mrb[4].mxu0 %v913_v44  ;;  %v1004_v54 = vpop.permute.xlu1 %1003 }
 0x715   : > { %1221 = vmatprep.mubr.msk.f32.mxu0 %vm1016_vm11, %v916_v45  ;;  %v999_v49 = vpop.permute.xlu0 %998 }
 0x718   : > { %1104 = vmatmul.mubr.f32.gmra.mrb[6].mxu0 %v915_v46  ;;  %v1014_v1 = vpop.permute.xlu1 %1013 }
 0x719   : > { %1222 = vmatprep.mubr.msk.f32.mxu0 %vm1016_vm11, %v918_v47  ;;  %v1009_v59 = vpop.permute.xlu0 %1008 }
 0x71c   : > { %1109 = vmatmul.mubr.f32.gmra.mrb[8].mxu0 %v917_v48 }
 0x7e3   : > { %v1095_v50 = vpop.f32.mrb[2].mxu0 }
 0x7e4   : > { %v1096_v51 = vadd.f32 %v1095_v50, %v999_v49  ;;  %v1097_v52 = vpop.f32.mrb[3].mxu0 }
 0x7e6   : > { %v1114_v53 = vmax.f32 %v1096_v51, 0.0 }
 0x7e7   : > { %v1100_v55 = vpop.f32.mrb[4].mxu0 }
 0x7e8   : > { %1118 = vst [vmem:[%s332_s16] sm:$0xff] %v1114_v53  ;;  %v1101_v56 = vadd.f32 %v1100_v55, %v1004_v54  ;;  %v1102_v57 = vpop.f32.mrb[5].mxu0 }
 0x7ea   : > { %v1115_v58 = vmax.f32 %v1101_v56, 0.0 }
 0x7eb   : > { %v1105_v60 = vpop.f32.mrb[6].mxu0 }
 0x7ec   : > { %1119 = vst [vmem:[%s332_s16 + $0x8] sm:$0xff] %v1115_v58  ;;  %v1106_v61 = vadd.f32 %v1105_v60, %v1009_v59  ;;  %v1107_v62 = vpop.f32.mrb[7].mxu0 }
 0x7ee   : > { %v1116_v63 = vmax.f32 %v1106_v61, 0.0 }
 0x7ef   : > { %v1110_v2 = vpop.f32.mrb[8].mxu0 }
 0x7f0   : > { %1120 = vst [vmem:[%s332_s16 + $0x10] sm:$0xff] %v1116_v63  ;;  %v1111_v3 = vadd.f32 %v1110_v2, %v1014_v1  ;;  %v1112_v4 = vpop.f32.mrb[9].mxu0 }
 0x7f2   : > { %v1117_v5 = vmax.f32 %v1111_v3, 0.0 }
 0x7f4   : > { %1121 = vst [vmem:[%s332_s16 + $0x18] sm:$0xff] %v1117_v5 }
 0x7f5 PF: > { %s19_s30 = sadd.s32 1, %s1529_s30  }
 0x7f6   : > { %p16_p4 = scmp.ge.s32.totalorder %s19_s30, 4  }
 0x7f8   :  { %18 = sbr.rel (!%p16_p4) target bundleno = 1 (0x1), region = 86 }

</bundles_post_ra>
